<compile_context>
chip_gen: v5e
topology: v5e:2x2
jax: 0.10.0
libtpu: 0.0.40
codegen_flags: <defaults>
</compile_context>

<pallas_src>
import functools

import jax
import jax.numpy as jnp
from jax.experimental import pallas as pl
from jax.experimental.pallas import tpu as pltpu


def _ds_partial_kernel(hw, tile, acc_w, masked, x_ref, y_ref, out_ref,
                       bce_acc, inter_acc, psum_acc, tsum_acc):
    """Accumulates per-channel BCE / Dice partial sums for one batch-block."""
    t = pl.program_id(1)

    @pl.when(t == 0)
    def _():
        bce_acc[...] = jnp.zeros_like(bce_acc)
        inter_acc[...] = jnp.zeros_like(inter_acc)
        psum_acc[...] = jnp.zeros_like(psum_acc)
        tsum_acc[...] = jnp.zeros_like(tsum_acc)

    bblk, n_ch, _ = x_ref.shape
    k = tile // acc_w            # chunks per tile (compile-time)

    # Register-resident partials: a single VMEM read-modify-write per grid step
    # instead of one per input vreg (vst is the narrowest bundle slot).
    bce_p = jnp.zeros((n_ch, acc_w), jnp.float32)
    inter_p = jnp.zeros((n_ch, acc_w), jnp.float32)
    psum_p = jnp.zeros((n_ch, acc_w), jnp.float32)
    tsum_p = jnp.zeros((1, acc_w), jnp.float32)

    for bb in range(bblk):
        for c in range(k):
            c0 = c * acc_w       # static, 128-aligned lane offset
            x = x_ref[bb, :, c0:c0 + acc_w].astype(jnp.float32)   # (N, acc_w)
            y = y_ref[bb, :, c0:c0 + acc_w].astype(jnp.float32)   # (1, acc_w)
            if masked:
                # Ragged tail: zero garbage BEFORE any transcendental.
                col = (jax.lax.broadcasted_iota(jnp.int32, (1, acc_w), 1)
                       + t * tile + c0)
                vb = col < hw
                v = vb.astype(jnp.float32)
                x = jnp.where(vb, x, 0.0)
                y = jnp.where(vb, y, 0.0)
            # sigmoid + numerically-stable BCE with 2 EUP pushes (tanh, log).
            ax = jnp.abs(x)
            s_abs = 0.5 * (1.0 + jnp.tanh(0.5 * ax))      # sigmoid(|x|)
            s = jnp.where(x >= 0.0, s_abs, 1.0 - s_abs)   # sigmoid(x)
            bce = jnp.maximum(x, 0.0) - x * y - jnp.log(s_abs)
            if masked:
                bce = bce * v                             # bce(0,0) = log 2 != 0
                s = s * v                                 # sigmoid(0) = 0.5 != 0
            bce_p = bce_p + bce
            inter_p = inter_p + s * y
            psum_p = psum_p + s
            tsum_p = tsum_p + y

    bce_acc[...] += bce_p
    inter_acc[...] += inter_p
    psum_acc[...] += psum_p
    tsum_acc[...] += tsum_p

    @pl.when(t == pl.num_programs(1) - 1)
    def _():
        # Single cross-lane (XLU) reduce over the narrow accumulators, then pack
        # per-channel partials into lanes 0..3 of a (N, 128) output block.
        bce_c = jnp.sum(bce_acc[...], axis=1, keepdims=True)      # (N, 1)
        inter_c = jnp.sum(inter_acc[...], axis=1, keepdims=True)  # (N, 1)
        psum_c = jnp.sum(psum_acc[...], axis=1, keepdims=True)    # (N, 1)
        tsum = jnp.sum(tsum_acc[...])                             # scalar
        lane = jax.lax.broadcasted_iota(jnp.int32, (n_ch, 128), 1)
        out = (jnp.where(lane == 0, bce_c, 0.0)
               + jnp.where(lane == 1, inter_c, 0.0)
               + jnp.where(lane == 2, psum_c, 0.0)
               + jnp.where(lane == 3, tsum, 0.0))
        out_ref[...] = out


def _round_up(a, m):
    return (a + m - 1) // m * m


def deep_supervision_loss(pres, gts, tile_cap=32768):
    """pres: (B, N, H, W) logits (any float dtype); gts: (B, 1, H, W) / (B, H, W)."""
    if isinstance(gts, tuple):
        gts = gts[0]
    B, N = int(pres.shape[0]), int(pres.shape[1])
    hw = 1
    for d in pres.shape[2:]:
        hw *= int(d)

    # Native dtypes — no host-side f32 pass over the tensors; reshape is free.
    x = pres.reshape(B, N, hw)
    if not jnp.issubdtype(gts.dtype, jnp.floating):
        gts = gts.astype(jnp.bfloat16)     # 0/1 exactly representable, 2 bytes
    y = gts.reshape(B, 1, hw)

    # ---- tile / accumulator sizing (VMEM-budgeted, (8,128)-legal) -----------
    acc_base = 512
    x_bytes = jnp.dtype(x.dtype).itemsize
    y_bytes = jnp.dtype(y.dtype).itemsize
    budget = 12 * 1024 * 1024                       # double-buffered input blocks
    per_lane = 2 * (N * x_bytes + y_bytes)
    cap = max(acc_base, (budget // per_lane) // acc_base * acc_base)
    tile_cap = max(acc_base, min(int(tile_cap), cap))

    if hw <= acc_base:
        acc_w = _round_up(hw, 128)                  # small images: one chunk
        tile = acc_w
    else:
        acc_w = acc_base
        tile = min(_round_up(hw, acc_base), tile_cap)
    n_tiles = pl.cdiv(hw, tile)
    masked = (n_tiles * tile != hw)                 # compile-time ragged-tail flag

    # Batch-blocking amortizes per-grid-step overhead when HW is small.
    max_bblk = max(1, min(16, tile_cap // tile))
    bblk = 1
    for d in range(min(B, max_bblk), 0, -1):
        if B % d == 0:
            bblk = d
            break
    n_bblocks = B // bblk

    kernel = functools.partial(_ds_partial_kernel, hw, tile, acc_w, masked)
    parts = pl.pallas_call(
        kernel,
        out_shape=jax.ShapeDtypeStruct((n_bblocks, N, 128), jnp.float32),
        grid_spec=pltpu.PrefetchScalarGridSpec(
            num_scalar_prefetch=0,
            grid=(n_bblocks, n_tiles),
            in_specs=[
                pl.BlockSpec((bblk, N, tile), lambda b, t: (b, 0, t)),   # logits
                pl.BlockSpec((bblk, 1, tile), lambda b, t: (b, 0, t)),   # targets
            ],
            out_specs=pl.BlockSpec((None, N, 128), lambda b, t: (b, 0, 0)),
            scratch_shapes=[
                pltpu.VMEM((N, acc_w), jnp.float32),   # BCE partial sums
                pltpu.VMEM((N, acc_w), jnp.float32),   # intersection partials
                pltpu.VMEM((N, acc_w), jnp.float32),   # sigmoid-sum partials
                pltpu.VMEM((1, acc_w), jnp.float32),   # target-sum partials
            ],
        ),
        compiler_params=pltpu.CompilerParams(
            # batch-block axis is independent -> megacore-splittable on v7x;
            # pixel axis carries the scratch accumulators -> arbitrary.
            dimension_semantics=("parallel", "arbitrary"),
            vmem_limit_bytes=32 * 1024 * 1024,
        ),
    )(x, y)

    # Tiny per-channel BCE/Dice combine in plain JAX (3N+1 scalars).
    smooth, eps = 1e-5, 1e-7
    bce_sum = parts[:, :, 0].sum(axis=0)             # (N,)
    inter = parts[:, :, 1].sum(axis=0)               # (N,)
    psum = parts[:, :, 2].sum(axis=0)                # (N,)
    tsum = parts[:, 0, 3].sum()                      # scalar (row 0 only)
    bce_mean = bce_sum / float(B * hw)
    dsc = (2.0 * inter + smooth) / jnp.maximum(psum + tsum + smooth, eps)
    return jnp.mean(bce_mean + (1.0 - dsc))


def _reference(pres, gts):
    """Pure-JAX transcription of DeepSupervisionLoss.forward (PyTorch semantics)."""
    if isinstance(gts, tuple):
        gts = gts[0]
    B, N = pres.shape[0], pres.shape[1]
    x = pres.astype(jnp.float32).reshape(B, N, -1)
    y = gts.astype(jnp.float32).reshape(B, 1, -1)
    smooth, eps = 1e-5, 1e-7
    total = 0.0
    for i in range(N):
        xi = x[:, i:i + 1, :]
        bce = jnp.mean(jnp.maximum(xi, 0.0) - xi * y
                       + jnp.log1p(jnp.exp(-jnp.abs(xi))))
        s = jax.nn.sigmoid(xi)
        inter = jnp.sum(s * y)
        dsc = (2.0 * inter + smooth) / jnp.maximum(s.sum() + y.sum() + smooth, eps)
        total = total + bce + (1.0 - dsc)
    return total / N


if __name__ == "__main__":
    B, N, H, W = 2, 4, 16, 16
    key = jax.random.PRNGKey(0)
    k1, k2 = jax.random.split(key)
    pres = jax.random.normal(k1, (B, N, H, W), dtype=jnp.float32)
    gts = (jax.random.uniform(k2, (B, 1, H, W)) > 0.5).astype(jnp.float32)

    loss = jax.block_until_ready(deep_supervision_loss(pres, gts))
    ref = jax.block_until_ready(_reference(pres, gts))
    assert jnp.allclose(loss, ref, atol=1e-4, rtol=1e-4), (loss, ref)
    print("KERNEL_OK")
</pallas_src>

<mosaic_0001>
module attributes {stable_mosaic.version = 11 : i64} {
  func.func @_ds_partial_kernel(%arg0: i32, %arg1: i32, %arg2: memref<2x4x256xf32, #tpu.memory_space<vmem>>, %arg3: memref<2x1x256xf32, #tpu.memory_space<vmem>>, %arg4: memref<1x4x128xf32, #tpu.memory_space<vmem>>, %arg5: memref<4x256xf32, #tpu.memory_space<vmem>>, %arg6: memref<4x256xf32, #tpu.memory_space<vmem>>, %arg7: memref<4x256xf32, #tpu.memory_space<vmem>>, %arg8: memref<1x256xf32, #tpu.memory_space<vmem>>) attributes {dimension_semantics = [#tpu.dimension_semantics<parallel>, #tpu.dimension_semantics<arbitrary>], iteration_bounds = array<i64: 1, 1>, scalar_prefetch = 0 : i64, scratch_operands = 4 : i64, tpu.core_type = #tpu.core_type<tc>, window_params = [{transform_indices = @transform_0, window_bounds = array<i64: 2, 4, 256>}, {transform_indices = @transform_1, window_bounds = array<i64: 2, 1, 256>}, {transform_indices = @transform_2, window_bounds = array<i64: 1, 4, 128>}]} {
    %c0_i32 = arith.constant 0 : i32
    %0 = arith.cmpi eq, %arg1, %c0_i32 : i32
    %1 = arith.extui %0 : i1 to i32
    %c0_i32_0 = arith.constant 0 : i32
    %2 = arith.cmpi ne, %1, %c0_i32_0 : i32
    scf.if %2 {
      %cst_44 = arith.constant 0.000000e+00 : f32
      %82 = vector.broadcast %cst_44 : f32 to vector<4x256xf32>
      %c0_45 = arith.constant 0 : index
      %c0_46 = arith.constant 0 : index
      %83 = vector.load %arg5[%c0_45, %c0_46] : memref<4x256xf32, #tpu.memory_space<vmem>>, vector<4x256xf32>
      tpu.vector_store %arg5[%c0_45, %c0_46], %82 {strides = array<i32>} : memref<4x256xf32, #tpu.memory_space<vmem>>, vector<4x256xf32>,
      %cst_47 = arith.constant 0.000000e+00 : f32
      %84 = vector.broadcast %cst_47 : f32 to vector<4x256xf32>
      %c0_48 = arith.constant 0 : index
      %c0_49 = arith.constant 0 : index
      %85 = vector.load %arg6[%c0_48, %c0_49] : memref<4x256xf32, #tpu.memory_space<vmem>>, vector<4x256xf32>
      tpu.vector_store %arg6[%c0_48, %c0_49], %84 {strides = array<i32>} : memref<4x256xf32, #tpu.memory_space<vmem>>, vector<4x256xf32>,
      %cst_50 = arith.constant 0.000000e+00 : f32
      %86 = vector.broadcast %cst_50 : f32 to vector<4x256xf32>
      %c0_51 = arith.constant 0 : index
      %c0_52 = arith.constant 0 : index
      %87 = vector.load %arg7[%c0_51, %c0_52] : memref<4x256xf32, #tpu.memory_space<vmem>>, vector<4x256xf32>
      tpu.vector_store %arg7[%c0_51, %c0_52], %86 {strides = array<i32>} : memref<4x256xf32, #tpu.memory_space<vmem>>, vector<4x256xf32>,
      %cst_53 = arith.constant 0.000000e+00 : f32
      %88 = vector.broadcast %cst_53 : f32 to vector<1x256xf32>
      %c0_54 = arith.constant 0 : index
      %c0_55 = arith.constant 0 : index
      %89 = vector.load %arg8[%c0_54, %c0_55] : memref<1x256xf32, #tpu.memory_space<vmem>>, vector<1x256xf32>
      tpu.vector_store %arg8[%c0_54, %c0_55], %88 {strides = array<i32>} : memref<1x256xf32, #tpu.memory_space<vmem>>, vector<1x256xf32>,
    } else {
    }
    %cst = arith.constant 0.000000e+00 : f32
    %3 = vector.broadcast %cst : f32 to vector<4x256xf32>
    %cst_1 = arith.constant 0.000000e+00 : f32
    %4 = vector.broadcast %cst_1 : f32 to vector<4x256xf32>
    %cst_2 = arith.constant 0.000000e+00 : f32
    %5 = vector.broadcast %cst_2 : f32 to vector<4x256xf32>
    %cst_3 = arith.constant 0.000000e+00 : f32
    %6 = vector.broadcast %cst_3 : f32 to vector<1x256xf32>
    %c0 = arith.constant 0 : index
    %c0_4 = arith.constant 0 : index
    %c0_5 = arith.constant 0 : index
    %7 = vector.load %arg2[%c0, %c0_4, %c0_5] : memref<2x4x256xf32, #tpu.memory_space<vmem>>, vector<1x4x256xf32>
    %8 = vector.shape_cast %7 : vector<1x4x256xf32> to vector<4x256xf32>
    %c0_6 = arith.constant 0 : index
    %c0_7 = arith.constant 0 : index
    %c0_8 = arith.constant 0 : index
    %9 = vector.load %arg3[%c0_6, %c0_7, %c0_8] : memref<2x1x256xf32, #tpu.memory_space<vmem>>, vector<1x1x256xf32>
    %10 = vector.shape_cast %9 : vector<1x1x256xf32> to vector<1x256xf32>
    %11 = math.absf %8 : vector<4x256xf32>
    %cst_9 = arith.constant 5.000000e-01 : f32
    %12 = vector.broadcast %cst_9 : f32 to vector<4x256xf32>
    %13 = arith.mulf %12, %11 : vector<4x256xf32>
    %14 = math.tanh %13 : vector<4x256xf32>
    %cst_10 = arith.constant 1.000000e+00 : f32
    %15 = vector.broadcast %cst_10 : f32 to vector<4x256xf32>
    %16 = arith.addf %15, %14 : vector<4x256xf32>
    %cst_11 = arith.constant 5.000000e-01 : f32
    %17 = vector.broadcast %cst_11 : f32 to vector<4x256xf32>
    %18 = arith.mulf %17, %16 : vector<4x256xf32>
    %cst_12 = arith.constant 0.000000e+00 : f32
    %19 = vector.broadcast %cst_12 : f32 to vector<4x256xf32>
    %20 = arith.cmpf oge, %8, %19 : vector<4x256xf32>
    %cst_13 = arith.constant 1.000000e+00 : f32
    %21 = vector.broadcast %cst_13 : f32 to vector<4x256xf32>
    %22 = arith.subf %21, %18 : vector<4x256xf32>
    %23 = arith.select %20, %18, %22 : vector<4x256xi1>, vector<4x256xf32>
    %cst_14 = arith.constant 0.000000e+00 : f32
    %24 = vector.broadcast %cst_14 : f32 to vector<4x256xf32>
    %25 = arith.maximumf %8, %24 : vector<4x256xf32>
    %26 = vector.broadcast %10 : vector<1x256xf32> to vector<4x256xf32>
    %27 = arith.mulf %8, %26 : vector<4x256xf32>
    %28 = arith.subf %25, %27 : vector<4x256xf32>
    %29 = math.log %18 : vector<4x256xf32>
    %30 = arith.subf %28, %29 : vector<4x256xf32>
    %31 = arith.addf %3, %30 : vector<4x256xf32>
    %32 = vector.broadcast %10 : vector<1x256xf32> to vector<4x256xf32>
    %33 = arith.mulf %23, %32 : vector<4x256xf32>
    %34 = arith.addf %4, %33 : vector<4x256xf32>
    %35 = arith.addf %5, %23 : vector<4x256xf32>
    %36 = arith.addf %6, %10 : vector<1x256xf32>
    %c1 = arith.constant 1 : index
    %c0_15 = arith.constant 0 : index
    %c0_16 = arith.constant 0 : index
    %37 = vector.load %arg2[%c1, %c0_15, %c0_16] : memref<2x4x256xf32, #tpu.memory_space<vmem>>, vector<1x4x256xf32>
    %38 = vector.shape_cast %37 : vector<1x4x256xf32> to vector<4x256xf32>
    %c1_17 = arith.constant 1 : index
    %c0_18 = arith.constant 0 : index
    %c0_19 = arith.constant 0 : index
    %39 = vector.load %arg3[%c1_17, %c0_18, %c0_19] : memref<2x1x256xf32, #tpu.memory_space<vmem>>, vector<1x1x256xf32>
    %40 = vector.shape_cast %39 : vector<1x1x256xf32> to vector<1x256xf32>
    %41 = math.absf %38 : vector<4x256xf32>
    %cst_20 = arith.constant 5.000000e-01 : f32
    %42 = vector.broadcast %cst_20 : f32 to vector<4x256xf32>
    %43 = arith.mulf %42, %41 : vector<4x256xf32>
    %44 = math.tanh %43 : vector<4x256xf32>
    %cst_21 = arith.constant 1.000000e+00 : f32
    %45 = vector.broadcast %cst_21 : f32 to vector<4x256xf32>
    %46 = arith.addf %45, %44 : vector<4x256xf32>
    %cst_22 = arith.constant 5.000000e-01 : f32
    %47 = vector.broadcast %cst_22 : f32 to vector<4x256xf32>
    %48 = arith.mulf %47, %46 : vector<4x256xf32>
    %cst_23 = arith.constant 0.000000e+00 : f32
    %49 = vector.broadcast %cst_23 : f32 to vector<4x256xf32>
    %50 = arith.cmpf oge, %38, %49 : vector<4x256xf32>
    %cst_24 = arith.constant 1.000000e+00 : f32
    %51 = vector.broadcast %cst_24 : f32 to vector<4x256xf32>
    %52 = arith.subf %51, %48 : vector<4x256xf32>
    %53 = arith.select %50, %48, %52 : vector<4x256xi1>, vector<4x256xf32>
    %cst_25 = arith.constant 0.000000e+00 : f32
    %54 = vector.broadcast %cst_25 : f32 to vector<4x256xf32>
    %55 = arith.maximumf %38, %54 : vector<4x256xf32>
    %56 = vector.broadcast %40 : vector<1x256xf32> to vector<4x256xf32>
    %57 = arith.mulf %38, %56 : vector<4x256xf32>
    %58 = arith.subf %55, %57 : vector<4x256xf32>
    %59 = math.log %48 : vector<4x256xf32>
    %60 = arith.subf %58, %59 : vector<4x256xf32>
    %61 = arith.addf %31, %60 : vector<4x256xf32>
    %62 = vector.broadcast %40 : vector<1x256xf32> to vector<4x256xf32>
    %63 = arith.mulf %53, %62 : vector<4x256xf32>
    %64 = arith.addf %34, %63 : vector<4x256xf32>
    %65 = arith.addf %35, %53 : vector<4x256xf32>
    %66 = arith.addf %36, %40 : vector<1x256xf32>
    %c0_26 = arith.constant 0 : index
    %c0_27 = arith.constant 0 : index
    %67 = vector.load %arg5[%c0_26, %c0_27] : memref<4x256xf32, #tpu.memory_space<vmem>>, vector<4x256xf32>
    %68 = arith.addf %67, %61 : vector<4x256xf32>
    %c0_28 = arith.constant 0 : index
    %c0_29 = arith.constant 0 : index
    %69 = vector.load %arg5[%c0_28, %c0_29] : memref<4x256xf32, #tpu.memory_space<vmem>>, vector<4x256xf32>
    tpu.vector_store %arg5[%c0_28, %c0_29], %68 {strides = array<i32>} : memref<4x256xf32, #tpu.memory_space<vmem>>, vector<4x256xf32>,
    %c0_30 = arith.constant 0 : index
    %c0_31 = arith.constant 0 : index
    %70 = vector.load %arg6[%c0_30, %c0_31] : memref<4x256xf32, #tpu.memory_space<vmem>>, vector<4x256xf32>
    %71 = arith.addf %70, %64 : vector<4x256xf32>
    %c0_32 = arith.constant 0 : index
    %c0_33 = arith.constant 0 : index
    %72 = vector.load %arg6[%c0_32, %c0_33] : memref<4x256xf32, #tpu.memory_space<vmem>>, vector<4x256xf32>
    tpu.vector_store %arg6[%c0_32, %c0_33], %71 {strides = array<i32>} : memref<4x256xf32, #tpu.memory_space<vmem>>, vector<4x256xf32>,
    %c0_34 = arith.constant 0 : index
    %c0_35 = arith.constant 0 : index
    %73 = vector.load %arg7[%c0_34, %c0_35] : memref<4x256xf32, #tpu.memory_space<vmem>>, vector<4x256xf32>
    %74 = arith.addf %73, %65 : vector<4x256xf32>
    %c0_36 = arith.constant 0 : index
    %c0_37 = arith.constant 0 : index
    %75 = vector.load %arg7[%c0_36, %c0_37] : memref<4x256xf32, #tpu.memory_space<vmem>>, vector<4x256xf32>
    tpu.vector_store %arg7[%c0_36, %c0_37], %74 {strides = array<i32>} : memref<4x256xf32, #tpu.memory_space<vmem>>, vector<4x256xf32>,
    %c0_38 = arith.constant 0 : index
    %c0_39 = arith.constant 0 : index
    %76 = vector.load %arg8[%c0_38, %c0_39] : memref<1x256xf32, #tpu.memory_space<vmem>>, vector<1x256xf32>
    %77 = arith.addf %76, %66 : vector<1x256xf32>
    %c0_40 = arith.constant 0 : index
    %c0_41 = arith.constant 0 : index
    %78 = vector.load %arg8[%c0_40, %c0_41] : memref<1x256xf32, #tpu.memory_space<vmem>>, vector<1x256xf32>
    tpu.vector_store %arg8[%c0_40, %c0_41], %77 {strides = array<i32>} : memref<1x256xf32, #tpu.memory_space<vmem>>, vector<1x256xf32>,
    %c0_i32_42 = arith.constant 0 : i32
    %79 = arith.cmpi eq, %arg1, %c0_i32_42 : i32
    %80 = arith.extui %79 : i1 to i32
    %c0_i32_43 = arith.constant 0 : i32
    %81 = arith.cmpi ne, %80, %c0_i32_43 : i32
    scf.if %81 {
      %c0_44 = arith.constant 0 : index
      %c0_45 = arith.constant 0 : index
      %82 = vector.load %arg5[%c0_44, %c0_45] : memref<4x256xf32, #tpu.memory_space<vmem>>, vector<4x256xf32>
      %cst_46 = arith.constant dense<0.000000e+00> : vector<4xf32>
      %83 = vector.multi_reduction <add>, %82, %cst_46 [1] : vector<4x256xf32> to vector<4xf32>
      %84 = vector.shape_cast %83 : vector<4xf32> to vector<4x1xf32>
      %c0_47 = arith.constant 0 : index
      %c0_48 = arith.constant 0 : index
      %85 = vector.load %arg6[%c0_47, %c0_48] : memref<4x256xf32, #tpu.memory_space<vmem>>, vector<4x256xf32>
      %cst_49 = arith.constant dense<0.000000e+00> : vector<4xf32>
      %86 = vector.multi_reduction <add>, %85, %cst_49 [1] : vector<4x256xf32> to vector<4xf32>
      %87 = vector.shape_cast %86 : vector<4xf32> to vector<4x1xf32>
      %c0_50 = arith.constant 0 : index
      %c0_51 = arith.constant 0 : index
      %88 = vector.load %arg7[%c0_50, %c0_51] : memref<4x256xf32, #tpu.memory_space<vmem>>, vector<4x256xf32>
      %cst_52 = arith.constant dense<0.000000e+00> : vector<4xf32>
      %89 = vector.multi_reduction <add>, %88, %cst_52 [1] : vector<4x256xf32> to vector<4xf32>
      %90 = vector.shape_cast %89 : vector<4xf32> to vector<4x1xf32>
      %c0_53 = arith.constant 0 : index
      %c0_54 = arith.constant 0 : index
      %91 = vector.load %arg8[%c0_53, %c0_54] : memref<1x256xf32, #tpu.memory_space<vmem>>, vector<1x256xf32>
      %92 = vector.shape_cast %91 : vector<1x256xf32> to vector<1x1x256xf32>
      %cst_55 = arith.constant dense<0.000000e+00> : vector<1xf32>
      %93 = vector.multi_reduction <add>, %92, %cst_55 [1, 2] : vector<1x1x256xf32> to vector<1xf32>
      %94 = vector.shape_cast %93 : vector<1xf32> to vector<1x1x1xf32>
      %95 = vector.extract %94[0, 0, 0] : f32 from vector<1x1x1xf32>
      %96 = tpu.iota {dimensions = array<i32: 1>} : vector<4x128xi32>
      %c0_i32_56 = arith.constant 0 : i32
      %97 = vector.broadcast %c0_i32_56 : i32 to vector<4x128xi32>
      %98 = arith.cmpi eq, %96, %97 : vector<4x128xi32>
      %cst_57 = arith.constant 0.000000e+00 : f32
      %99 = vector.shape_cast %84 : vector<4x1xf32> to vector<4x1xf32>
      %100 = vector.broadcast %99 : vector<4x1xf32> to vector<4x128xf32>
      %101 = vector.broadcast %cst_57 : f32 to vector<4x128xf32>
      %102 = arith.select %98, %100, %101 : vector<4x128xi1>, vector<4x128xf32>
      %c1_i32 = arith.constant 1 : i32
      %103 = vector.broadcast %c1_i32 : i32 to vector<4x128xi32>
      %104 = arith.cmpi eq, %96, %103 : vector<4x128xi32>
      %cst_58 = arith.constant 0.000000e+00 : f32
      %105 = vector.shape_cast %87 : vector<4x1xf32> to vector<4x1xf32>
      %106 = vector.broadcast %105 : vector<4x1xf32> to vector<4x128xf32>
      %107 = vector.broadcast %cst_58 : f32 to vector<4x128xf32>
      %108 = arith.select %104, %106, %107 : vector<4x128xi1>, vector<4x128xf32>
      %109 = arith.addf %102, %108 : vector<4x128xf32>
      %c2_i32 = arith.constant 2 : i32
      %110 = vector.broadcast %c2_i32 : i32 to vector<4x128xi32>
      %111 = arith.cmpi eq, %96, %110 : vector<4x128xi32>
      %cst_59 = arith.constant 0.000000e+00 : f32
      %112 = vector.shape_cast %90 : vector<4x1xf32> to vector<4x1xf32>
      %113 = vector.broadcast %112 : vector<4x1xf32> to vector<4x128xf32>
      %114 = vector.broadcast %cst_59 : f32 to vector<4x128xf32>
      %115 = arith.select %111, %113, %114 : vector<4x128xi1>, vector<4x128xf32>
      %116 = arith.addf %109, %115 : vector<4x128xf32>
      %c3_i32 = arith.constant 3 : i32
      %117 = vector.broadcast %c3_i32 : i32 to vector<4x128xi32>
      %118 = arith.cmpi eq, %96, %117 : vector<4x128xi32>
      %cst_60 = arith.constant 0.000000e+00 : f32
      %119 = vector.broadcast %95 : f32 to vector<4x128xf32>
      %120 = vector.broadcast %cst_60 : f32 to vector<4x128xf32>
      %121 = arith.select %118, %119, %120 : vector<4x128xi1>, vector<4x128xf32>
      %122 = arith.addf %116, %121 : vector<4x128xf32>
      %c0_61 = arith.constant 0 : index
      %c0_62 = arith.constant 0 : index
      %c0_63 = arith.constant 0 : index
      %123 = vector.load %arg4[%c0_61, %c0_62, %c0_63] : memref<1x4x128xf32, #tpu.memory_space<vmem>>, vector<1x4x128xf32>
      %124 = vector.shape_cast %123 : vector<1x4x128xf32> to vector<4x128xf32>
      %125 = vector.shape_cast %122 : vector<4x128xf32> to vector<1x4x128xf32>
      tpu.vector_store %arg4[%c0_61, %c0_62, %c0_63], %125 {strides = array<i32>} : memref<1x4x128xf32, #tpu.memory_space<vmem>>, vector<1x4x128xf32>,
    } else {
    }
    return
  }
  func.func @transform_0(%arg0: i32, %arg1: i32) -> (i32, i32, i32) {
    %c0_i32 = arith.constant 0 : i32
    %c0_i32_0 = arith.constant 0 : i32
    return %arg0, %c0_i32, %arg1 : i32, i32, i32
  }
  func.func @transform_1(%arg0: i32, %arg1: i32) -> (i32, i32, i32) {
    %c0_i32 = arith.constant 0 : i32
    %c0_i32_0 = arith.constant 0 : i32
    return %arg0, %c0_i32, %arg1 : i32, i32, i32
  }
  func.func @transform_2(%arg0: i32, %arg1: i32) -> (i32, i32, i32) {
    %c0_i32 = arith.constant 0 : i32
    %c0_i32_0 = arith.constant 0 : i32
    %c0_i32_1 = arith.constant 0 : i32
    return %arg0, %c0_i32, %c0_i32_0 : i32, i32, i32
  }
}

</mosaic_0001>

<bundles_post_ra>
// kernel: tpu_custom_call.1
= control target key start
LH: loop header
LB: loop body
LE: loop exit
PB: predicated region body
PF: predicated region fallthrough
CT: control target
= control target key end

     0   :  { %7 = vsyncpa [#allocation7], 0  ;;  %s358_s0 = inlined_call_operand.hbm [shape: f32[2,4,256], index: 0, kind: input, shape index: {}]   ;;  %s359_s1 = inlined_call_operand.hbm [shape: f32[2,1,256], index: 1, kind: input, shape index: {}]   ;;  %s360_s2 = inlined_call_operand.hbm [shape: f32[1,4,128], index: 2, kind: output, shape index: {}]  }
   0x1   :  { %8 = vsyncpa [#allocation10], 0 }
   0x2   :  { %9 = vsyncpa [#allocation8], 0  ;;  %s14_s11 = sshll.u32 %s358_s0, 4  ;;  %s316_s12 = smov [#allocation6]   ;;  %s15_s11 = int_to_ptr.hbm [resolvable:$true] %s14_s11 }
   0x3   :  { %s16_s13 = sshll.u32 %s316_s12, 4  ;;  %s27_s16 = sshll.u32 %s359_s1, 4  ;;  %s17_s13 = int_to_ptr.vmem [resolvable:$true] %s16_s13  ;;  %s28_s16 = int_to_ptr.hbm [resolvable:$true] %s27_s16 }
   0x4   :  { %s317_s17 = smov 128   ;;  %s318_s18 = smov 8  }
   0x5   :  { %22 = dma.hbm_to_vmem [thread:$0]  %s15_s11, 256, %s17_s13, [#allocation7], %s317_s17, %s317_s17, %s318_s18  }
   0x6   :  { %s319_s19 = smov [#allocation9]   ;;  %s320_s21 = smov 32  }
   0x7   :  { %s29_s20 = sshll.u32 %s319_s19, 4  ;;  %s321_s22 = smov 2   ;;  %s30_s20 = int_to_ptr.vmem [resolvable:$true] %s29_s20 }
   0x8   :  { %35 = dma.hbm_to_vmem [thread:$0]  %s28_s16, 64, %s30_s20, [#allocation10], %s320_s21, %s320_s21, %s321_s22  }
   0x9   :  { %310 = dma.done.wait [#allocation7], 256  }
   0xa   :  { %311 = vsyncadd [#allocation7], 4294967040 }
   0xb   :  { %312 = dma.done.wait [#allocation10], 64  }
   0xc   :  { %313 = vsyncadd [#allocation10], 4294967232  ;;  %v51_v0 = vlaneseq  ;;  %v322_v1 = vmov 0.0   ;;  %v57_v2 = vld [vmem:[#allocation9] sm:$0x3]  ;;  %v56_v4 = vld [vmem:[#allocation6] sm:$0xff] }
   0xd   :  { %v87_v3 = vld [vmem:[#allocation9 + $0x2] sm:$0x3]  ;;  %v58_v6 = vand.u32 2147483647, %v56_v4  ;;  %v85_v7 = vld [vmem:[#allocation6 + $0x8] sm:$0xff]  ;;  %v69_v13 = vperm.slane %v57_v2, 1 }
   0xe   :  { %vm53_vm0 = vcmp.lt.s32.totalorder %v51_v0, 256  ;;  %v112_v5 = vadd.f32 %v87_v3, %v57_v2  ;;  %v88_v8 = vand.u32 2147483647, %v85_v7  ;;  %v99_v14 = vperm.slane %v87_v3, 1  ;;  %s323_s0 = smov [#allocation11]   ;;  %s209_s26 = sshll.u32 %s360_s2, 4  ;;  %s210_s26 = int_to_ptr.hbm [resolvable:$true] %s209_s26 }
   0xf   :  { %55 = vst.msk [vmem:[#allocation5] sm:$0x3] %vm53_vm0, %v322_v1  ;;  %v59_v10 = vmul.f32 0.5, %v58_v6  ;;  %v68_v15 = vperm.slane %v57_v2, 0  ;;  %v70_v16 = vrot.slane %v69_v13, 4  ;;  %vm71_vm1 = vcmask 1043456  }
  0x10   :  { %v89_v12 = vmul.f32 0.5, %v88_v8  ;;  %v98_v18 = vperm.slane %v87_v3, 0  ;;  %v100_v19 = vrot.slane %v99_v14, 4  ;;  %vm174_vm2 = vcmask 1040384   ;;  %s207_s1 = sshll.u32 %s323_s0, 4  ;;  %s208_s1 = int_to_ptr.vmem [resolvable:$true] %s207_s1 }
  0x11   :  { %230 = vtanh.f32 %v59_v10  ;;  %v72_v27 = vsel %vm71_vm1, %v68_v15, %v70_v16  ;;  %v66_v33 = vmax.f32 %v56_v4, 0.0  ;;  %v96_v35 = vmax.f32 %v85_v7, 0.0 }
  0x12   :  { %232 = vtanh.f32 %v89_v12  ;;  %v101_v29 = vsel %vm71_vm1, %v98_v18, %v100_v19  ;;  %v74_v34 = vmul.f32 %v72_v27, %v56_v4  ;;  %vm63_vm3 = vcmp.ge.f32.partialorder %v56_v4, 0.0 }
  0x13   :  { %v103_v36 = vmul.f32 %v101_v29, %v85_v7  ;;  %vm93_vm4 = vcmp.ge.f32.partialorder %v85_v7, 0.0  ;;  %v188_v14 = vand.u32 127, %v51_v0 }
  0x14   :  { %v75_v37 = vsub.f32 %v66_v33, %v74_v34 }
  0x15   :  { %v104_v39 = vsub.f32 %v96_v35, %v103_v36  ;;  %vm191_vm5 = vcmp.eq.s32.totalorder %v188_v14, 1  ;;  %vm189_vm6 = vcmp.eq.s32.totalorder %v188_v14, 0  ;;  %vm194_vm7 = vcmp.eq.s32.totalorder %v188_v14, 2 }
  0x16   :  { %v122_v9 = vld [vmem:[#allocation5] sm:$0x3]  ;;  %vm197_vm8 = vcmp.eq.s32.totalorder %v188_v14, 3 }
  0x17   :  { %v123_v11 = vadd.f32 %v122_v9, %v112_v5  ;;  %v231_v17 = vpop.eup %230 }
  0x18   :  { %v233_v20 = vpop.eup %232  ;;  %v61_v21 = vadd.f32 1.0, %v231_v17 }
  0x19   :  { %128 = vst.msk [vmem:[#allocation5] sm:$0x3] %vm53_vm0, %v123_v11  ;;  %v91_v23 = vadd.f32 1.0, %v233_v20 }
  0x1a   :  { %v62_v26 = vmul.f32 0.5, %v61_v21 }
  0x1b   :  { %v92_v28 = vmul.f32 0.5, %v91_v23 }
  0x1c   :  { %234 = vlog2.f32 %v62_v26  ;;  %v64_v41 = vsub.f32 1.0, %v62_v26 }
  0x1d   :  { %236 = vlog2.f32 %v92_v28  ;;  %v94_v43 = vsub.f32 1.0, %v92_v28 }
  0x1e   :  { %v65_v47 = vsel %vm63_vm3, %v62_v26, %v64_v41 }
  0x1f   :  { %v95_v48 = vsel %vm93_vm4, %v92_v28, %v94_v43  ;;  %v80_v50 = vmul.f32 %v72_v27, %v65_v47 }
  0x20   :  { %v168_v22 = vld [vmem:[#allocation5] sm:$0x3]  ;;  %v109_v51 = vmul.f32 %v101_v29, %v95_v48  ;;  %v111_v58 = vadd.f32 %v95_v48, %v65_v47 }
  0x21   :  { %v170_v24 = vperm.slane %v168_v22, 0  ;;  %v171_v25 = vperm.slane %v168_v22, 1 }
  0x22   :  { %v235_v38 = vpop.eup %234  ;;  %v110_v52 = vadd.f32 %v109_v51, %v80_v50 }
  0x23   :  { %v175_v30 = vsel %vm174_vm2, %v170_v24, 0.0  ;;  %v176_v31 = vsel %vm174_vm2, %v171_v25, 0.0  ;;  %v237_v40 = vpop.eup %236  ;;  %v77_v42 = vmul.f32 0.6931472, %v235_v38 }
  0x24   :  { %v177_v32 = vadd.f32 %v176_v31, %v175_v30  ;;  %v106_v44 = vmul.f32 0.6931472, %v237_v40 }
  0x25   :  { %v78_v45 = vsub.f32 %v75_v37, %v77_v42 }
  0x26   :  { %178 = vadd.xlane.f32.xlu0 %v177_v32  ;;  %v107_v46 = vsub.f32 %v104_v39, %v106_v44 }
  0x28   :  { %v108_v49 = vadd.f32 %v107_v46, %v78_v45 }
  0x2a   :  { %134 = vst [vmem:[#allocation1] ss:$2 sm:$0xff] %v108_v49 }
  0x31   :  { %v135_v53 = vld.sshfl [vmem:[#allocation1] sm:$0xff pattern:$0x75316420]  ;;  %v136_v54 = vld.sshfl [vmem:[#allocation1 + $0x8] sm:$0xff pattern:$0x75316420] }
  0x32   :  { %146 = vst [vmem:[#allocation1] ss:$2 sm:$0xff] %v110_v52  ;;  %v139_v55 = vsel %vm71_vm1, %v135_v53, 0.0  ;;  %v140_v56 = vsel %vm71_vm1, %v136_v54, 0.0 }
  0x33   :  { %v141_v57 = vadd.f32 %v140_v56, %v139_v55 }
  0x35   :  { %142 = vadd.xlane.f32.xlu0 %v141_v57 }
  0x39   :  { %v147_v59 = vld.sshfl [vmem:[#allocation1] sm:$0xff pattern:$0x75316420]  ;;  %v148_v60 = vld.sshfl [vmem:[#allocation1 + $0x8] sm:$0xff pattern:$0x75316420] }
  0x3a   :  { %v151_v61 = vsel %vm71_vm1, %v147_v59, 0.0  ;;  %v152_v62 = vsel %vm71_vm1, %v148_v60, 0.0  ;;  %158 = vst [vmem:[#allocation1] ss:$2 sm:$0xff] %v111_v58 }
  0x3b   :  { %v153_v63 = vadd.f32 %v152_v62, %v151_v61 }
  0x3d   :  { %154 = vadd.xlane.f32.xlu1 %v153_v63 }
  0x41   :  { %v159_v1 = vld.sshfl [vmem:[#allocation1] sm:$0xff pattern:$0x75316420]  ;;  %v160_v2 = vld.sshfl [vmem:[#allocation1 + $0x8] sm:$0xff pattern:$0x75316420] }
  0x42   :  { %v163_v3 = vsel %vm71_vm1, %v159_v1, 0.0  ;;  %v164_v4 = vsel %vm71_vm1, %v160_v2, 0.0 }
  0x43   :  { %v165_v5 = vadd.f32 %v164_v4, %v163_v3 }
  0x45   :  { %166 = vadd.xlane.f32.xlu1 %v165_v5 }
  0x99   :  { %v179_v6 = vpop.xlane.xlu0 %178 }
  0x9a   :  { %v180_v7 = vrot.slane %v179_v6, 4 }
  0x9c   :  { %v181_v8 = vadd.f32 %v180_v7, %v179_v6 }
  0x9e   :  { %v182_v9 = vrot.slane %v181_v8, 2 }
  0xa0   :  { %v183_v10 = vadd.f32 %v182_v9, %v181_v8 }
  0xa2   :  { %v184_v11 = vrot.slane %v183_v10, 1 }
  0xa4   :  { %v185_v12 = vadd.f32 %v184_v11, %v183_v10 }
  0xa6   :  { %220 = vpush %v185_v12 }
  0xa8   :  { %v143_v15 = vpop.xlane.xlu0 %142 }
  0xa9   :  { %v190_v17 = vsel %vm189_vm6, %v143_v15, 0.0 }
  0xb0   :  { %v155_v13 = vpop.xlane.xlu1 %154 }
  0xb1   :  { %v192_v16 = vsel %vm191_vm5, %v155_v13, 0.0 }
  0xb2   :  { %v193_v19 = vadd.f32 %v192_v16, %v190_v17 }
  0xb8   :  { %v167_v18 = vpop.xlane.xlu1 %166 }
  0xb9   :  { %v195_v20 = vsel %vm194_vm7, %v167_v18, 0.0 }
  0xba   :  { %v196_v21 = vadd.f32 %v195_v20, %v193_v19 }
  0xd7   :  { %s221_s23 = spop %220 }
  0xd8   :  { %v198_v22 = vstv %s221_s23 }
  0xd9   :  { %v199_v0 = vsel %vm197_vm8, %v198_v22, 0.0 }
  0xda   :  { %v200_v23 = vadd.f32 %v199_v0, %v196_v21 }
  0xdc   :  { %201 = vst [vmem:[#allocation11] sm:$0xf] %v200_v23 }
  0xdd   :  { %212 = dma.vmem_to_hbm [thread:$0]  %s208_s1, 64, %s210_s26, [#allocation8]  }
  0xde   :  { %314 = dma.done.wait [#allocation8], 64  }
  0xdf   :  { %315 = vsyncadd [#allocation8], 4294967232 }
  0xe0   :  { %217 = vsyncpa [#allocation7], 1 }
  0xe1   :  { %218 = vsyncpa [#allocation10], 1 }
  0xe2   :  { %219 = vsyncpa [#allocation8], 1 }

</bundles_post_ra>
